<compile_context>
chip_gen: v7x
topology: tpu7x:2x2x1
jax: 0.10.0
libtpu: 0.0.40
codegen_flags: <defaults>
</compile_context>

<pallas_src>
import functools

import jax
import jax.numpy as jnp
from jax.experimental import pallas as pl
from jax.experimental.pallas import tpu as pltpu


_LANE = 128
_SUBLANE = 8
_VMEM_BUDGET = 40 * 1024 * 1024   # conservative: fits v7x's 64 MiB VMEM with headroom


def _round_up(n, m):
    return ((n + m - 1) // m) * m


def _make_mlp_kernel(n_layers):
    """Fused n-layer MLP on one (TB, in_pad0) bf16 batch tile.

    Every layer's in/out dim is zero-padded to a multiple of 128, so padded
    columns remain exactly zero across layers (0 @ W + 0 bias -> LeakyReLU(0)
    = 0); the wrapper slices out the real output columns.
    """

    def kernel(*refs):
        x_ref = refs[0]
        w_refs = refs[1:1 + n_layers]                # bf16 (in_pad_i, out_pad_i), resident
        b_refs = refs[1 + n_layers:1 + 2 * n_layers]  # f32 (1, out_pad_i), resident
        o_ref = refs[1 + 2 * n_layers]               # bf16 (TB, out_pad_last)

        h = x_ref[...]                               # bf16
        for i in range(n_layers):
            # bf16 operands into the MXU, f32 accumulation.
            y = jnp.dot(h, w_refs[i][...], preferred_element_type=jnp.float32)
            y = y + b_refs[i][...]                   # f32 bias, (1, out_pad_i) broadcast
            if i < n_layers - 1:
                y = jnp.maximum(y, 0.1 * y)          # LeakyReLU(0.1), f32
                h = y.astype(jnp.bfloat16)           # bf16 back into the next MXU
                # eval-mode Dropout(0.2) == identity (training mode would draw a
                # mask here via pltpu.prng_seed / pltpu.prng_random_bits).
            else:
                h = y
        o_ref[...] = h.astype(o_ref.dtype)

    return kernel


def prepare_params(params):
    """One-time packing (call outside the per-forward path).

    params: list of (W, b) with W of shape (in, out), b of shape (1, out).
    Returns per-layer zero-padded bf16 weights and f32 biases, each padded to
    a multiple of 128 on both dims (lane-dense, layer-matched).
    """
    packed_w, packed_b = [], []
    for w, b in params:
        d_in, d_out = w.shape
        in_pad, out_pad = _round_up(d_in, _LANE), _round_up(d_out, _LANE)
        w_p = jnp.zeros((in_pad, out_pad), jnp.bfloat16)
        w_p = w_p.at[:d_in, :d_out].set(w.astype(jnp.bfloat16))
        b_p = jnp.zeros((1, out_pad), jnp.float32)
        b_p = b_p.at[0, :d_out].set(b.reshape(-1).astype(jnp.float32))
        packed_w.append(w_p)
        packed_b.append(b_p)
    return tuple(packed_w), tuple(packed_b)


def _choose_tb(B, in_pad0, out_pad_last, max_pad, weight_bytes, bias_bytes):
    """Largest batch tile that fits the VMEM budget with bounded padding waste."""
    fixed = 2 * (weight_bytes + bias_bytes)          # resident slabs (default double-buffered)
    per_row = (2 * in_pad0 * 2                        # double-buffered bf16 x tile
               + 2 * out_pad_last * 2                 # double-buffered bf16 out tile
               + 2 * max_pad * 4)                     # ~2 live f32 intermediates (h, y)
    b8 = _round_up(B, _SUBLANE)
    cands = [tb for tb in (8, 16, 32, 64, 128, 256, 512, 1024, 2048, 4096)
             if tb <= b8 and fixed + tb * per_row <= _VMEM_BUDGET]
    if not cands:
        return _SUBLANE
    # Cap zero-row batch padding at ~B/8 rows (or the 8-row minimum).
    max_waste = max(B // 8, b8 - B)
    ok = [tb for tb in cands if _round_up(B, tb) - B <= max_waste]
    return max(ok) if ok else min(cands)


@functools.partial(jax.jit, static_argnames=("out_dim",))
def mlp_score_layer(x, packed_w, packed_b, out_dim):
    """x: (B, input_dim) f32/bf16. packed_w/packed_b: from prepare_params()."""
    B, input_dim = x.shape
    n_layers = len(packed_w)
    in_pad0 = packed_w[0].shape[0]
    out_pad_last = packed_w[-1].shape[1]
    max_pad = max(in_pad0, max(w.shape[1] for w in packed_w))

    weight_bytes = sum(w.size * 2 for w in packed_w)   # bf16
    bias_bytes = sum(b.size * 4 for b in packed_b)     # f32
    tb = _choose_tb(B, in_pad0, out_pad_last, max_pad, weight_bytes, bias_bytes)
    b_pad = _round_up(B, tb)

    # bf16 activation I/O: single pad+cast here, kernel consumes bf16 directly.
    x_pad = jnp.zeros((b_pad, in_pad0), jnp.bfloat16)
    x_pad = x_pad.at[:B, :input_dim].set(x.astype(jnp.bfloat16))

    w_specs = [pl.BlockSpec(w.shape, lambda i: (0, 0)) for w in packed_w]
    b_specs = [pl.BlockSpec(b.shape, lambda i: (0, 0)) for b in packed_b]

    out_pad = pl.pallas_call(
        _make_mlp_kernel(n_layers),
        out_shape=jax.ShapeDtypeStruct((b_pad, out_pad_last), jnp.bfloat16),
        grid=(b_pad // tb,),
        in_specs=[pl.BlockSpec((tb, in_pad0), lambda i: (i, 0))] + w_specs + b_specs,
        out_specs=pl.BlockSpec((tb, out_pad_last), lambda i: (i, 0)),
        compiler_params=pltpu.CompilerParams(
            dimension_semantics=("parallel",),
            vmem_limit_bytes=48 * 1024 * 1024),
    )(x_pad, *packed_w, *packed_b)

    return out_pad[:B, :out_dim].astype(x.dtype)


def init_params(key, input_dim, output_dim, h1, h2, h3, h4):
    """PyTorch-Linear-style init; weights returned pre-transposed (in, out)."""
    dims = [(input_dim, h1), (h1, h2), (h2, h3), (h3, h4), (h4, output_dim)]
    params = []
    for i, (d_in, d_out) in enumerate(dims):
        kw, kb, key = jax.random.split(jax.random.fold_in(key, i), 3)
        bound = 1.0 / (d_in ** 0.5)
        w_t = jax.random.uniform(kw, (d_in, d_out), jnp.float32, -bound, bound)
        b = jax.random.uniform(kb, (1, d_out), jnp.float32, -bound, bound)
        params.append((w_t, b))
    return params


def reference_forward_f32(x, params):
    h = x
    for i, (w, b) in enumerate(params):
        h = h @ w + b.reshape(1, -1)
        if i < len(params) - 1:
            h = jnp.where(h > 0, h, 0.1 * h)
    return h


def reference_forward_bf16(x, params):
    """Matches kernel numerics: bf16 operands/activations, f32 accumulate, bf16 output."""
    h = x.astype(jnp.bfloat16)
    for i, (w, b) in enumerate(params):
        y = jnp.dot(h, w.astype(jnp.bfloat16),
                    preferred_element_type=jnp.float32) + b.reshape(1, -1)
        if i < len(params) - 1:
            y = jnp.maximum(y, 0.1 * y)
            h = y.astype(jnp.bfloat16)
        else:
            h = y
    return h.astype(jnp.bfloat16).astype(jnp.float32)


if __name__ == "__main__":
    key = jax.random.PRNGKey(0)

    B, input_dim, output_dim = 8, 32, 4
    h1, h2, h3, h4 = 64, 64, 32, 32

    kx, kp = jax.random.split(key)
    x = jax.random.normal(kx, (B, input_dim), jnp.float32)
    params = init_params(kp, input_dim, output_dim, h1, h2, h3, h4)

    packed_w, packed_b = prepare_params(params)   # one-time packing, outside the call path
    out = jax.block_until_ready(mlp_score_layer(x, packed_w, packed_b, output_dim))
    assert out.shape == (B, output_dim), out.shape

    ref_bf16 = reference_forward_bf16(x, params)
    ref_f32 = reference_forward_f32(x, params)
    assert jnp.allclose(out, ref_bf16, atol=1e-3, rtol=1e-3), \
        float(jnp.max(jnp.abs(out - ref_bf16)))
    assert jnp.allclose(out, ref_f32, atol=3e-2, rtol=3e-2), \
        float(jnp.max(jnp.abs(out - ref_f32)))

    print("KERNEL_OK")
</pallas_src>

<mosaic_0001>
module attributes {stable_mosaic.version = 11 : i64} {
  func.func @kernel(%arg0: i32, %arg1: memref<8x128xbf16, #tpu.memory_space<vmem>>, %arg2: memref<128x128xbf16, #tpu.memory_space<vmem>>, %arg3: memref<128x128xbf16, #tpu.memory_space<vmem>>, %arg4: memref<128x128xbf16, #tpu.memory_space<vmem>>, %arg5: memref<128x128xbf16, #tpu.memory_space<vmem>>, %arg6: memref<128x128xbf16, #tpu.memory_space<vmem>>, %arg7: memref<1x128xf32, #tpu.memory_space<vmem>>, %arg8: memref<1x128xf32, #tpu.memory_space<vmem>>, %arg9: memref<1x128xf32, #tpu.memory_space<vmem>>, %arg10: memref<1x128xf32, #tpu.memory_space<vmem>>, %arg11: memref<1x128xf32, #tpu.memory_space<vmem>>, %arg12: memref<8x128xbf16, #tpu.memory_space<vmem>>) attributes {dimension_semantics = [#tpu.dimension_semantics<parallel>], iteration_bounds = array<i64: 1>, scalar_prefetch = 0 : i64, scratch_operands = 0 : i64, tpu.core_type = #tpu.core_type<tc>, window_params = [{transform_indices = @transform_0, window_bounds = array<i64: 8, 128>}, {pipeline_mode = #tpu.pipeline_mode<synchronous>, transform_indices = @transform_1, window_bounds = array<i64: 128, 128>}, {pipeline_mode = #tpu.pipeline_mode<synchronous>, transform_indices = @transform_2, window_bounds = array<i64: 128, 128>}, {pipeline_mode = #tpu.pipeline_mode<synchronous>, transform_indices = @transform_3, window_bounds = array<i64: 128, 128>}, {pipeline_mode = #tpu.pipeline_mode<synchronous>, transform_indices = @transform_4, window_bounds = array<i64: 128, 128>}, {pipeline_mode = #tpu.pipeline_mode<synchronous>, transform_indices = @transform_5, window_bounds = array<i64: 128, 128>}, {pipeline_mode = #tpu.pipeline_mode<synchronous>, transform_indices = @transform_6, window_bounds = array<i64: 1, 128>}, {pipeline_mode = #tpu.pipeline_mode<synchronous>, transform_indices = @transform_7, window_bounds = array<i64: 1, 128>}, {pipeline_mode = #tpu.pipeline_mode<synchronous>, transform_indices = @transform_8, window_bounds = array<i64: 1, 128>}, {pipeline_mode = #tpu.pipeline_mode<synchronous>, transform_indices = @transform_9, window_bounds = array<i64: 1, 128>}, {pipeline_mode = #tpu.pipeline_mode<synchronous>, transform_indices = @transform_10, window_bounds = array<i64: 1, 128>}, {transform_indices = @transform_11, window_bounds = array<i64: 8, 128>}]} {
    %c0 = arith.constant 0 : index
    %c0_0 = arith.constant 0 : index
    %0 = vector.load %arg1[%c0, %c0_0] : memref<8x128xbf16, #tpu.memory_space<vmem>>, vector<8x128xbf16>
    %c0_1 = arith.constant 0 : index
    %c0_2 = arith.constant 0 : index
    %1 = vector.load %arg2[%c0_1, %c0_2] : memref<128x128xbf16, #tpu.memory_space<vmem>>, vector<128x128xbf16>
    %cst = arith.constant dense<0.000000e+00> : vector<8x128xf32>
    %2 = tpu.matmul %0, %1, %cst {dimension_numbers = #tpu.dot_dimension_numbers<[1], [0], [0], [1], [0, 0, 1, 1], [], []>} : vector<8x128xbf16>, vector<128x128xbf16>, vector<8x128xf32> -> vector<8x128xf32>
    %c0_3 = arith.constant 0 : index
    %c0_4 = arith.constant 0 : index
    %3 = vector.load %arg7[%c0_3, %c0_4] : memref<1x128xf32, #tpu.memory_space<vmem>>, vector<1x128xf32>
    %4 = vector.broadcast %3 : vector<1x128xf32> to vector<8x128xf32>
    %5 = arith.addf %2, %4 : vector<8x128xf32>
    %cst_5 = arith.constant 1.000000e-01 : f32
    %6 = vector.broadcast %cst_5 : f32 to vector<8x128xf32>
    %7 = arith.mulf %6, %5 : vector<8x128xf32>
    %8 = arith.maximumf %5, %7 : vector<8x128xf32>
    %9 = arith.truncf %8 : vector<8x128xf32> to vector<8x128xbf16>
    %c0_6 = arith.constant 0 : index
    %c0_7 = arith.constant 0 : index
    %10 = vector.load %arg3[%c0_6, %c0_7] : memref<128x128xbf16, #tpu.memory_space<vmem>>, vector<128x128xbf16>
    %cst_8 = arith.constant dense<0.000000e+00> : vector<8x128xf32>
    %11 = tpu.matmul %9, %10, %cst_8 {dimension_numbers = #tpu.dot_dimension_numbers<[1], [0], [0], [1], [0, 0, 1, 1], [], []>} : vector<8x128xbf16>, vector<128x128xbf16>, vector<8x128xf32> -> vector<8x128xf32>
    %c0_9 = arith.constant 0 : index
    %c0_10 = arith.constant 0 : index
    %12 = vector.load %arg8[%c0_9, %c0_10] : memref<1x128xf32, #tpu.memory_space<vmem>>, vector<1x128xf32>
    %13 = vector.broadcast %12 : vector<1x128xf32> to vector<8x128xf32>
    %14 = arith.addf %11, %13 : vector<8x128xf32>
    %cst_11 = arith.constant 1.000000e-01 : f32
    %15 = vector.broadcast %cst_11 : f32 to vector<8x128xf32>
    %16 = arith.mulf %15, %14 : vector<8x128xf32>
    %17 = arith.maximumf %14, %16 : vector<8x128xf32>
    %18 = arith.truncf %17 : vector<8x128xf32> to vector<8x128xbf16>
    %c0_12 = arith.constant 0 : index
    %c0_13 = arith.constant 0 : index
    %19 = vector.load %arg4[%c0_12, %c0_13] : memref<128x128xbf16, #tpu.memory_space<vmem>>, vector<128x128xbf16>
    %cst_14 = arith.constant dense<0.000000e+00> : vector<8x128xf32>
    %20 = tpu.matmul %18, %19, %cst_14 {dimension_numbers = #tpu.dot_dimension_numbers<[1], [0], [0], [1], [0, 0, 1, 1], [], []>} : vector<8x128xbf16>, vector<128x128xbf16>, vector<8x128xf32> -> vector<8x128xf32>
    %c0_15 = arith.constant 0 : index
    %c0_16 = arith.constant 0 : index
    %21 = vector.load %arg9[%c0_15, %c0_16] : memref<1x128xf32, #tpu.memory_space<vmem>>, vector<1x128xf32>
    %22 = vector.broadcast %21 : vector<1x128xf32> to vector<8x128xf32>
    %23 = arith.addf %20, %22 : vector<8x128xf32>
    %cst_17 = arith.constant 1.000000e-01 : f32
    %24 = vector.broadcast %cst_17 : f32 to vector<8x128xf32>
    %25 = arith.mulf %24, %23 : vector<8x128xf32>
    %26 = arith.maximumf %23, %25 : vector<8x128xf32>
    %27 = arith.truncf %26 : vector<8x128xf32> to vector<8x128xbf16>
    %c0_18 = arith.constant 0 : index
    %c0_19 = arith.constant 0 : index
    %28 = vector.load %arg5[%c0_18, %c0_19] : memref<128x128xbf16, #tpu.memory_space<vmem>>, vector<128x128xbf16>
    %cst_20 = arith.constant dense<0.000000e+00> : vector<8x128xf32>
    %29 = tpu.matmul %27, %28, %cst_20 {dimension_numbers = #tpu.dot_dimension_numbers<[1], [0], [0], [1], [0, 0, 1, 1], [], []>} : vector<8x128xbf16>, vector<128x128xbf16>, vector<8x128xf32> -> vector<8x128xf32>
    %c0_21 = arith.constant 0 : index
    %c0_22 = arith.constant 0 : index
    %30 = vector.load %arg10[%c0_21, %c0_22] : memref<1x128xf32, #tpu.memory_space<vmem>>, vector<1x128xf32>
    %31 = vector.broadcast %30 : vector<1x128xf32> to vector<8x128xf32>
    %32 = arith.addf %29, %31 : vector<8x128xf32>
    %cst_23 = arith.constant 1.000000e-01 : f32
    %33 = vector.broadcast %cst_23 : f32 to vector<8x128xf32>
    %34 = arith.mulf %33, %32 : vector<8x128xf32>
    %35 = arith.maximumf %32, %34 : vector<8x128xf32>
    %36 = arith.truncf %35 : vector<8x128xf32> to vector<8x128xbf16>
    %c0_24 = arith.constant 0 : index
    %c0_25 = arith.constant 0 : index
    %37 = vector.load %arg6[%c0_24, %c0_25] : memref<128x128xbf16, #tpu.memory_space<vmem>>, vector<128x128xbf16>
    %cst_26 = arith.constant dense<0.000000e+00> : vector<8x128xf32>
    %38 = tpu.matmul %36, %37, %cst_26 {dimension_numbers = #tpu.dot_dimension_numbers<[1], [0], [0], [1], [0, 0, 1, 1], [], []>} : vector<8x128xbf16>, vector<128x128xbf16>, vector<8x128xf32> -> vector<8x128xf32>
    %c0_27 = arith.constant 0 : index
    %c0_28 = arith.constant 0 : index
    %39 = vector.load %arg11[%c0_27, %c0_28] : memref<1x128xf32, #tpu.memory_space<vmem>>, vector<1x128xf32>
    %40 = vector.broadcast %39 : vector<1x128xf32> to vector<8x128xf32>
    %41 = arith.addf %38, %40 : vector<8x128xf32>
    %42 = arith.truncf %41 : vector<8x128xf32> to vector<8x128xbf16>
    %c0_29 = arith.constant 0 : index
    %c0_30 = arith.constant 0 : index
    %43 = vector.load %arg12[%c0_29, %c0_30] : memref<8x128xbf16, #tpu.memory_space<vmem>>, vector<8x128xbf16>
    tpu.vector_store %arg12[%c0_29, %c0_30], %42 {strides = array<i32>} : memref<8x128xbf16, #tpu.memory_space<vmem>>, vector<8x128xbf16>,
    return
  }
  func.func @transform_0(%arg0: i32) -> (i32, i32) {
    %c0_i32 = arith.constant 0 : i32
    %c0_i32_0 = arith.constant 0 : i32
    return %arg0, %c0_i32 : i32, i32
  }
  func.func @transform_1(%arg0: i32) -> (i32, i32) {
    %c0_i32 = arith.constant 0 : i32
    %c0_i32_0 = arith.constant 0 : i32
    %c0_i32_1 = arith.constant 0 : i32
    return %c0_i32, %c0_i32_0 : i32, i32
  }
  func.func @transform_2(%arg0: i32) -> (i32, i32) {
    %c0_i32 = arith.constant 0 : i32
    %c0_i32_0 = arith.constant 0 : i32
    %c0_i32_1 = arith.constant 0 : i32
    return %c0_i32, %c0_i32_0 : i32, i32
  }
  func.func @transform_3(%arg0: i32) -> (i32, i32) {
    %c0_i32 = arith.constant 0 : i32
    %c0_i32_0 = arith.constant 0 : i32
    %c0_i32_1 = arith.constant 0 : i32
    return %c0_i32, %c0_i32_0 : i32, i32
  }
  func.func @transform_4(%arg0: i32) -> (i32, i32) {
    %c0_i32 = arith.constant 0 : i32
    %c0_i32_0 = arith.constant 0 : i32
    %c0_i32_1 = arith.constant 0 : i32
    return %c0_i32, %c0_i32_0 : i32, i32
  }
  func.func @transform_5(%arg0: i32) -> (i32, i32) {
    %c0_i32 = arith.constant 0 : i32
    %c0_i32_0 = arith.constant 0 : i32
    %c0_i32_1 = arith.constant 0 : i32
    return %c0_i32, %c0_i32_0 : i32, i32
  }
  func.func @transform_6(%arg0: i32) -> (i32, i32) {
    %c0_i32 = arith.constant 0 : i32
    %c0_i32_0 = arith.constant 0 : i32
    %c0_i32_1 = arith.constant 0 : i32
    return %c0_i32, %c0_i32_0 : i32, i32
  }
  func.func @transform_7(%arg0: i32) -> (i32, i32) {
    %c0_i32 = arith.constant 0 : i32
    %c0_i32_0 = arith.constant 0 : i32
    %c0_i32_1 = arith.constant 0 : i32
    return %c0_i32, %c0_i32_0 : i32, i32
  }
  func.func @transform_8(%arg0: i32) -> (i32, i32) {
    %c0_i32 = arith.constant 0 : i32
    %c0_i32_0 = arith.constant 0 : i32
    %c0_i32_1 = arith.constant 0 : i32
    return %c0_i32, %c0_i32_0 : i32, i32
  }
  func.func @transform_9(%arg0: i32) -> (i32, i32) {
    %c0_i32 = arith.constant 0 : i32
    %c0_i32_0 = arith.constant 0 : i32
    %c0_i32_1 = arith.constant 0 : i32
    return %c0_i32, %c0_i32_0 : i32, i32
  }
  func.func @transform_10(%arg0: i32) -> (i32, i32) {
    %c0_i32 = arith.constant 0 : i32
    %c0_i32_0 = arith.constant 0 : i32
    %c0_i32_1 = arith.constant 0 : i32
    return %c0_i32, %c0_i32_0 : i32, i32
  }
  func.func @transform_11(%arg0: i32) -> (i32, i32) {
    %c0_i32 = arith.constant 0 : i32
    %c0_i32_0 = arith.constant 0 : i32
    return %arg0, %c0_i32 : i32, i32
  }
}

</mosaic_0001>

<bundles_post_ra>
// kernel: mlp_score_layer.1
= control target key start
LH: loop header
LB: loop body
LE: loop exit
PB: predicated region body
PF: predicated region fallthrough
CT: control target
= control target key end

     0   :  { %16 = vsyncpa [#allocation3], 0  ;;  %s1268_s0 = inlined_call_operand.vmem [shape: bf16[8,128], index: 0, kind: input, shape index: {}]   ;;  %s1269_s1 = inlined_call_operand.hbm [shape: bf16[128,128], index: 1, kind: input, shape index: {}]   ;;  %s1270_s2 = inlined_call_operand.hbm [shape: bf16[128,128], index: 2, kind: input, shape index: {}]   ;;  %s1271_s3 = inlined_call_operand.hbm [shape: bf16[128,128], index: 3, kind: input, shape index: {}]   ;;  %s1272_s4 = inlined_call_operand.hbm [shape: bf16[128,128], index: 4, kind: input, shape index: {}]   ;;  %s1273_s5 = inlined_call_operand.hbm [shape: bf16[128,128], index: 5, kind: input, shape index: {}]   ;;  %s1274_s6 = inlined_call_operand.vmem [shape: f32[1,128], index: 6, kind: input, shape index: {}]   ;;  %s1275_s7 = inlined_call_operand.vmem [shape: f32[1,128], index: 7, kind: input, shape index: {}]   ;;  %s1276_s8 = inlined_call_operand.vmem [shape: f32[1,128], index: 8, kind: input, shape index: {}]   ;;  %s1277_s9 = inlined_call_operand.vmem [shape: f32[1,128], index: 9, kind: input, shape index: {}]   ;;  %s1278_s10 = inlined_call_operand.vmem [shape: f32[1,128], index: 10, kind: input, shape index: {}]   ;;  %s1279_s11 = inlined_call_operand.vmem [shape: bf16[8,128], index: 11, kind: output, shape index: {}]  }
   0x1   :  { %17 = vsyncpa [#allocation5], 0 }
   0x2   :  { %18 = vsyncpa [#allocation8], 0  ;;  %s1039_s17 = smov [#allocation4]   ;;  %s1040_s19 = smov [#allocation7]  }
   0x3   :  { %s38_s18 = sshll.u32 %s1039_s17, 4  ;;  %s62_s20 = sshll.u32 %s1040_s19, 4  ;;  %s39_s18 = int_to_ptr.vmem [resolvable:$true] %s38_s18  ;;  %s1108_s20 = int_to_ptr.vmem [resolvable:$true] %s62_s20 }
   0x4   :  { %s923_s23 = scalar_lea.hbm %s1270_s2, 1024 }
   0x5   :  { %p924_p0 = scmp.ne.s32.totalorder %s1270_s2, %s923_s23  ;;  %p927_p1 = scmp.lt.u32.totalorder %s923_s23, %s1270_s2 }
   0x7   :  { %p929_p2 = pnand %p927_p1, %p924_p0 }
   0x9   :  { %932 = shalt.err (!%p929_p2)
}
   0xa   :  { %s933_s28 = scalar_lea.vmem %s39_s18, 1024  ;;  %p938_p4 = scmp.lt.s32.totalorder %s39_s18, %s39_s18 }
   0xb   :  { %p934_p3 = scmp.ne.s32.totalorder %s39_s18, %s933_s28  ;;  %p939_p5 = scmp.lt.s32.totalorder %s933_s28, %s933_s28 }
   0xd   :  { %p940_p6 = por %p939_p5, %p938_p4 }
   0xf   :  { %p941_p7 = pnand %p940_p6, %p934_p3 }
  0x11   :  { %944 = shalt.err (!%p941_p7)
}
  0x12   :  { %s1041_s29 = smov 64   ;;  %s1042_s30 = smov 4  }
  0x13   :  { %44 = dma.hbm_to_vmem [thread:$0]  %s1270_s2, 1024, %s39_s18, [#allocation5], %s1041_s29, %s1041_s29, %s1042_s30  }
  0x14   :  { %s945_s16 = scalar_lea.hbm %s1272_s4, 1024 }
  0x15   :  { %p946_p8 = scmp.ne.s32.totalorder %s1272_s4, %s945_s16  ;;  %p949_p9 = scmp.lt.u32.totalorder %s945_s16, %s1272_s4 }
  0x17   :  { %p951_p10 = pnand %p949_p9, %p946_p8 }
  0x19   :  { %954 = shalt.err (!%p951_p10)
}
  0x1a   :  { %s955_s23 = scalar_lea.vmem %s1108_s20, 1024  ;;  %p960_p12 = scmp.lt.s32.totalorder %s1108_s20, %s1108_s20 }
  0x1b   :  { %p956_p11 = scmp.ne.s32.totalorder %s1108_s20, %s955_s23  ;;  %p961_p13 = scmp.lt.s32.totalorder %s955_s23, %s955_s23 }
  0x1d   :  { %p962_p0 = por %p961_p13, %p960_p12 }
  0x1f   :  { %p963_p1 = pnand %p962_p0, %p956_p11 }
  0x21   :  { %966 = shalt.err (!%p963_p1)
}
  0x22   :  { %68 = dma.hbm_to_vmem [thread:$0]  %s1272_s4, 1024, %s1108_s20, [#allocation8], %s1041_s29, %s1041_s29, %s1042_s30  }
  0x23   :  { %s1043_s24 = smov [#allocation2]   ;;  %s1044_s26 = smov [#allocation6]  }
  0x24   :  { %s26_s25 = sshll.u32 %s1043_s24, 4  ;;  %s50_s27 = sshll.u32 %s1044_s26, 4  ;;  %s27_s25 = int_to_ptr.vmem [resolvable:$true] %s26_s25  ;;  %s1145_s27 = int_to_ptr.vmem [resolvable:$true] %s50_s27 }
  0x25   :  { %s967_s13 = scalar_lea.hbm %s1269_s1, 1024 }
  0x26   :  { %p968_p2 = scmp.ne.s32.totalorder %s1269_s1, %s967_s13  ;;  %p971_p3 = scmp.lt.u32.totalorder %s967_s13, %s1269_s1 }
  0x28   :  { %p973_p4 = pnand %p971_p3, %p968_p2 }
  0x2a   :  { %976 = shalt.err (!%p973_p4)
}
  0x2b   :  { %s977_s4 = scalar_lea.vmem %s27_s25, 1024  ;;  %p982_p6 = scmp.lt.s32.totalorder %s27_s25, %s27_s25 }
  0x2c   :  { %p978_p5 = scmp.ne.s32.totalorder %s27_s25, %s977_s4  ;;  %p983_p7 = scmp.lt.s32.totalorder %s977_s4, %s977_s4 }
  0x2e   :  { %p984_p8 = por %p983_p7, %p982_p6 }
  0x30   :  { %p985_p9 = pnand %p984_p8, %p978_p5 }
  0x32   :  { %988 = shalt.err (!%p985_p9)
}
  0x33   :  { %32 = dma.hbm_to_vmem [thread:$0]  %s1269_s1, 1024, %s27_s25, [#allocation3], %s1041_s29, %s1041_s29, %s1042_s30  }
  0x34   :  { %s989_s23 = scalar_lea.hbm %s1271_s3, 1024 }
  0x35   :  { %p990_p10 = scmp.ne.s32.totalorder %s1271_s3, %s989_s23  ;;  %p993_p11 = scmp.lt.u32.totalorder %s989_s23, %s1271_s3 }
  0x37   :  { %p995_p12 = pnand %p993_p11, %p990_p10 }
  0x39   :  { %998 = shalt.err (!%p995_p12)
}
  0x3a   :  { %s999_s28 = scalar_lea.vmem %s1145_s27, 1024  ;;  %p1004_p0 = scmp.lt.s32.totalorder %s1145_s27, %s1145_s27 }
  0x3b   :  { %p1000_p13 = scmp.ne.s32.totalorder %s1145_s27, %s999_s28  ;;  %p1005_p1 = scmp.lt.s32.totalorder %s999_s28, %s999_s28 }
  0x3d   :  { %p1006_p2 = por %p1005_p1, %p1004_p0 }
  0x3f   :  { %p1007_p3 = pnand %p1006_p2, %p1000_p13 }
  0x41   :  { %1010 = shalt.err (!%p1007_p3)
}
  0x42   :  { %56 = dma.hbm_to_vmem [thread:$0]  %s1271_s3, 1024, %s1145_s27, [#allocation5], %s1041_s29, %s1041_s29, %s1042_s30  }
  0x43   :  { %s1045_s12 = smov [#allocation9]   ;;  %s1011_s16 = scalar_lea.hbm %s1273_s5, 1024 }
  0x44   :  { %s74_s13 = sshll.u32 %s1045_s12, 4  ;;  %p1012_p4 = scmp.ne.s32.totalorder %s1273_s5, %s1011_s16  ;;  %s75_s13 = int_to_ptr.vmem [resolvable:$true] %s74_s13 }
  0x45   :  { %p1015_p5 = scmp.lt.u32.totalorder %s1011_s16, %s1273_s5 }
  0x47   :  { %p1017_p6 = pnand %p1015_p5, %p1012_p4 }
  0x49   :  { %1020 = shalt.err (!%p1017_p6)
}
  0x4a   :  { %s1021_s21 = scalar_lea.vmem %s75_s13, 1024  ;;  %p1026_p8 = scmp.lt.s32.totalorder %s75_s13, %s75_s13 }
  0x4b   :  { %p1022_p7 = scmp.ne.s32.totalorder %s75_s13, %s1021_s21  ;;  %p1027_p9 = scmp.lt.s32.totalorder %s1021_s21, %s1021_s21 }
  0x4d   :  { %p1028_p10 = por %p1027_p9, %p1026_p8 }
  0x4f   :  { %p1029_p11 = pnand %p1028_p10, %p1022_p7 }
  0x51   :  { %1032 = shalt.err (!%p1029_p11)
}
  0x52   :  { %80 = dma.hbm_to_vmem [thread:$0]  %s1273_s5, 1024, %s75_s13, [#allocation8], %s1041_s29, %s1041_s29, %s1042_s30  }
  0x53   :  { %1033 = dma.done.wait [#allocation3], 1024  }
  0x54   :  { %1034 = vsyncadd [#allocation3], 4294966272 }
  0x55   :  { %1035 = dma.done.wait [#allocation5], 2048  }
  0x56   :  { %1036 = vsyncadd [#allocation5], 4294965248 }
  0x57   :  { %1037 = dma.done.wait [#allocation8], 2048  }
  0x58   :  { %1038 = vsyncadd [#allocation8], 4294965248  ;;  %v1046_v0 = vmov 0.0   ;;  %vm1047_vm0 = vmmov 0   ;;  %v883_v1 = vld [vmem:[#allocation2] sm:$0xff]   ;;  %v884_v2 = vld [vmem:[#allocation2 + $0x8] sm:$0xff]  }
  0x59   :  { %774 = vmatprep.subr.bf16.mxu0 %v1046_v0  ;;  %790 = vmatprep.mubr.msk.bf16.mxu0 %vm1047_vm0, %v1046_v0  ;;  %v885_v3 = vld [vmem:[#allocation2 + $0x10] sm:$0xff]   ;;  %v891_v4 = vld [vmem:[#allocation4] sm:$0xff]   ;;  %v886_v5 = vld [vmem:[#allocation2 + $0x18] sm:$0xff]  }
  0x5a   :  { %794 = vmatprep.subr.bf16.mxu1 %v1046_v0  ;;  %810 = vmatprep.mubr.msk.bf16.mxu1 %vm1047_vm0, %v1046_v0  ;;  %v892_v6 = vld [vmem:[#allocation4 + $0x8] sm:$0xff]   ;;  %v887_v7 = vld [vmem:[#allocation2 + $0x20] sm:$0xff]   ;;  %v893_v8 = vld [vmem:[#allocation4 + $0x10] sm:$0xff]  }
  0x5b   :  { %775 = vmatpush3.bf16.msra.mxu0 %v883_v1  ;;  %795 = vmatpush3.bf16.msra.mxu1 %v891_v4  ;;  %v888_v9 = vld [vmem:[#allocation2 + $0x28] sm:$0xff]   ;;  %v894_v10 = vld [vmem:[#allocation4 + $0x18] sm:$0xff]   ;;  %v889_v11 = vld [vmem:[#allocation2 + $0x30] sm:$0xff]  }
  0x5c   :  { %776 = vmatprep.subr.bf16.mxu0 %v1046_v0  ;;  %796 = vmatprep.subr.bf16.mxu1 %v1046_v0  ;;  %v895_v12 = vld [vmem:[#allocation4 + $0x20] sm:$0xff]   ;;  %v890_v13 = vld [vmem:[#allocation2 + $0x38] sm:$0xff]   ;;  %v896_v14 = vld [vmem:[#allocation4 + $0x28] sm:$0xff]  }
  0x5d   :  { %v107_v15 = vld [vmem:[%s1268_s0] sm:$0xf]  ;;  %v897_v16 = vld [vmem:[#allocation4 + $0x30] sm:$0xff]   ;;  %v898_v17 = vld [vmem:[#allocation4 + $0x38] sm:$0xff]  }
  0x5e   :  { %v899_v18 = vld [vmem:[#allocation6] sm:$0xff]   ;;  %v900_v19 = vld [vmem:[#allocation6 + $0x8] sm:$0xff]   ;;  %v901_v20 = vld [vmem:[#allocation6 + $0x10] sm:$0xff]  }
  0x5f   :  { %777 = vmatpush3.bf16.msra.mxu0 %v884_v2  ;;  %797 = vmatpush3.bf16.msra.mxu1 %v892_v6  ;;  %v902_v21 = vld [vmem:[#allocation6 + $0x18] sm:$0xff]   ;;  %v903_v22 = vld [vmem:[#allocation6 + $0x20] sm:$0xff]   ;;  %v904_v23 = vld [vmem:[#allocation6 + $0x28] sm:$0xff]  }
  0x60   :  { %778 = vmatprep.subr.bf16.mxu0 %v1046_v0  ;;  %798 = vmatprep.subr.bf16.mxu1 %v1046_v0  ;;  %v684_v24 = vld [vmem:[%s1274_s6] ss:$0 sm:$0xff]  ;;  %v905_v33 = vld [vmem:[#allocation6 + $0x30] sm:$0xff]   ;;  %v906_v34 = vld [vmem:[#allocation6 + $0x38] sm:$0xff]  }
  0x61   :  { %v907_v35 = vld [vmem:[#allocation7] sm:$0xff]   ;;  %v908_v36 = vld [vmem:[#allocation7 + $0x8] sm:$0xff]   ;;  %v909_v37 = vld [vmem:[#allocation7 + $0x10] sm:$0xff]  }
  0x62   :  { %v910_v38 = vld [vmem:[#allocation7 + $0x18] sm:$0xff]   ;;  %v911_v39 = vld [vmem:[#allocation7 + $0x20] sm:$0xff]   ;;  %v912_v40 = vld [vmem:[#allocation7 + $0x28] sm:$0xff]  }
  0x63   :  { %779 = vmatpush3.bf16.msra.mxu0 %v885_v3  ;;  %799 = vmatpush3.bf16.msra.mxu1 %v893_v8  ;;  %v693_v41 = vld [vmem:[%s1275_s7] ss:$0 sm:$0xff]  ;;  %v913_v50 = vld [vmem:[#allocation7 + $0x30] sm:$0xff]   ;;  %v914_v51 = vld [vmem:[#allocation7 + $0x38] sm:$0xff]  }
  0x64   :  { %780 = vmatprep.subr.bf16.mxu0 %v1046_v0  ;;  %800 = vmatprep.subr.bf16.mxu1 %v1046_v0  ;;  %v915_v52 = vld [vmem:[#allocation9] sm:$0xff]   ;;  %v916_v53 = vld [vmem:[#allocation9 + $0x8] sm:$0xff]   ;;  %v917_v54 = vld [vmem:[#allocation9 + $0x10] sm:$0xff]  }
  0x65   :  { %v918_v55 = vld [vmem:[#allocation9 + $0x18] sm:$0xff]   ;;  %v919_v56 = vld [vmem:[#allocation9 + $0x20] sm:$0xff]   ;;  %v920_v57 = vld [vmem:[#allocation9 + $0x28] sm:$0xff]  }
  0x66   :  { %v702_v58 = vld [vmem:[%s1276_s8] ss:$0 sm:$0xff]  ;;  %v921_v4 = vld [vmem:[#allocation9 + $0x30] sm:$0xff]  }
  0x67   :  { %781 = vmatpush3.bf16.msra.mxu0 %v886_v5  ;;  %801 = vmatpush3.bf16.msra.mxu1 %v894_v10  ;;  %v922_v5 = vld [vmem:[#allocation9 + $0x38] sm:$0xff]   ;;  %v711_v6 = vld [vmem:[%s1277_s9] ss:$0 sm:$0xff] }
  0x68   :  { %782 = vmatprep.subr.bf16.mxu0 %v1046_v0  ;;  %802 = vmatprep.subr.bf16.mxu1 %v1046_v0 }
  0x6b   :  { %783 = vmatpush3.bf16.msra.mxu0 %v887_v7  ;;  %803 = vmatpush3.bf16.msra.mxu1 %v895_v12 }
  0x6c   :  { %784 = vmatprep.subr.bf16.mxu0 %v1046_v0  ;;  %804 = vmatprep.subr.bf16.mxu1 %v1046_v0 }
  0x6f   :  { %785 = vmatpush3.bf16.msra.mxu0 %v888_v9  ;;  %805 = vmatpush3.bf16.msra.mxu1 %v896_v14 }
  0x70   :  { %786 = vmatprep.subr.bf16.mxu0 %v1046_v0  ;;  %806 = vmatprep.subr.bf16.mxu1 %v1046_v0 }
  0x73   :  { %787 = vmatpush3.bf16.msra.mxu0 %v889_v11  ;;  %807 = vmatpush3.bf16.msra.mxu1 %v897_v16 }
  0x74   :  { %788 = vmatprep.subr.bf16.mxu0 %v1046_v0  ;;  %808 = vmatprep.subr.bf16.mxu1 %v1046_v0 }
  0x77   :  { %789 = vmatpush3.bf16.msra.mxu0 %v890_v13  ;;  %809 = vmatpush3.bf16.msra.mxu1 %v898_v17 }
  0x78   :  { %814 = vmatprep.subr.bf16.mxu0 %v1046_v0  ;;  %834 = vmatprep.subr.bf16.mxu1 %v1046_v0 }
  0x7a   :  { %791 = vmatmul.mubr.bf16.vlgmr.msra.gmra.mrb[0].mxu0 %v107_v15  ;;  %v720_v15 = vld [vmem:[%s1278_s10] ss:$0 sm:$0xff] }
  0x7b   :  { %830 = vmatprep.mubr.msk.bf16.mxu0 %vm1047_vm0, %v1046_v0  ;;  %815 = vmatpush3.bf16.msra.mxu0 %v899_v18 }
  0x7c   :  { %816 = vmatprep.subr.bf16.mxu0 %v1046_v0 }
  0x7f   :  { %817 = vmatpush3.bf16.msra.mxu0 %v900_v19 }
  0x80   :  { %818 = vmatprep.subr.bf16.mxu0 %v1046_v0 }
  0x83   :  { %819 = vmatpush3.bf16.msra.mxu0 %v901_v20 }
  0x84   :  { %820 = vmatprep.subr.bf16.mxu0 %v1046_v0 }
  0x87   :  { %821 = vmatpush3.bf16.msra.mxu0 %v902_v21 }
  0x88   :  { %822 = vmatprep.subr.bf16.mxu0 %v1046_v0 }
  0x8b   :  { %823 = vmatpush3.bf16.msra.mxu0 %v903_v22 }
  0x8c   :  { %824 = vmatprep.subr.bf16.mxu0 %v1046_v0 }
  0x8f   :  { %825 = vmatpush3.bf16.msra.mxu0 %v904_v23 }
  0x90   :  { %826 = vmatprep.subr.bf16.mxu0 %v1046_v0 }
  0x93   :  { %827 = vmatpush3.bf16.msra.mxu0 %v905_v33 }
  0x94   :  { %828 = vmatprep.subr.bf16.mxu0 %v1046_v0 }
  0x97   :  { %829 = vmatpush3.bf16.msra.mxu0 %v906_v34 }
  0x98   :  { %854 = vmatprep.subr.bf16.mxu0 %v1046_v0 }
 0x14d   :  { %v213_v25 = vpop.f32.mrb[0].mxu0 }
 0x14e   :  { %v214_v26 = vadd.f32 %v684_v24, %v213_v25  ;;  %v792_v27 = vpop.f32.mrb[1].mxu0 }
 0x14f   :  { %v216_v28 = vpop.f32.mrb[2].mxu0 }
 0x150   :  { %v219_v29 = vmul.f32 0.1, %v214_v26  ;;  %v793_v30 = vpop.f32.mrb[3].mxu0 }
 0x152   :  { %v220_v31 = vmax.f32 %v214_v26, %v219_v29 }
 0x154   :  { %v221_v32 = vpack.c.bf16 %v220_v31, %v220_v31 }
 0x156   :  { %811 = vmatmul.mubr.bf16.vlgmr.msra.gmra.mrb[0].mxu1 %v221_v32 }
 0x157   :  { %850 = vmatprep.mubr.msk.bf16.mxu1 %vm1047_vm0, %v1046_v0  ;;  %835 = vmatpush3.bf16.msra.mxu1 %v907_v35 }
 0x158   :  { %836 = vmatprep.subr.bf16.mxu1 %v1046_v0 }
 0x15b   :  { %837 = vmatpush3.bf16.msra.mxu1 %v908_v36 }
 0x15c   :  { %838 = vmatprep.subr.bf16.mxu1 %v1046_v0 }
 0x15f   :  { %839 = vmatpush3.bf16.msra.mxu1 %v909_v37 }
 0x160   :  { %840 = vmatprep.subr.bf16.mxu1 %v1046_v0 }
 0x163   :  { %841 = vmatpush3.bf16.msra.mxu1 %v910_v38 }
 0x164   :  { %842 = vmatprep.subr.bf16.mxu1 %v1046_v0 }
 0x167   :  { %843 = vmatpush3.bf16.msra.mxu1 %v911_v39 }
 0x168   :  { %844 = vmatprep.subr.bf16.mxu1 %v1046_v0 }
 0x16b   :  { %845 = vmatpush3.bf16.msra.mxu1 %v912_v40 }
 0x16c   :  { %846 = vmatprep.subr.bf16.mxu1 %v1046_v0 }
 0x16f   :  { %847 = vmatpush3.bf16.msra.mxu1 %v913_v50 }
 0x170   :  { %848 = vmatprep.subr.bf16.mxu1 %v1046_v0 }
 0x173   :  { %849 = vmatpush3.bf16.msra.mxu1 %v914_v51 }
 0x229   :  { %v327_v42 = vpop.f32.mrb[0].mxu1 }
 0x22a   :  { %v328_v43 = vadd.f32 %v693_v41, %v327_v42  ;;  %v812_v44 = vpop.f32.mrb[1].mxu1 }
 0x22b   :  { %v330_v45 = vpop.f32.mrb[2].mxu1 }
 0x22c   :  { %v333_v46 = vmul.f32 0.1, %v328_v43  ;;  %v813_v47 = vpop.f32.mrb[3].mxu1 }
 0x22e   :  { %v334_v48 = vmax.f32 %v328_v43, %v333_v46 }
 0x230   :  { %v335_v49 = vpack.c.bf16 %v334_v48, %v334_v48 }
 0x232   :  { %831 = vmatmul.mubr.bf16.vlgmr.msra.gmra.mrb[4].mxu0 %v335_v49 }
 0x233   :  { %870 = vmatprep.mubr.msk.bf16.mxu0 %vm1047_vm0, %v1046_v0  ;;  %855 = vmatpush3.bf16.msra.mxu0 %v915_v52 }
 0x234   :  { %856 = vmatprep.subr.bf16.mxu0 %v1046_v0 }
 0x237   :  { %857 = vmatpush3.bf16.msra.mxu0 %v916_v53 }
 0x238   :  { %858 = vmatprep.subr.bf16.mxu0 %v1046_v0 }
 0x23b   :  { %859 = vmatpush3.bf16.msra.mxu0 %v917_v54 }
 0x23c   :  { %860 = vmatprep.subr.bf16.mxu0 %v1046_v0 }
 0x23f   :  { %861 = vmatpush3.bf16.msra.mxu0 %v918_v55 }
 0x240   :  { %862 = vmatprep.subr.bf16.mxu0 %v1046_v0 }
 0x243   :  { %863 = vmatpush3.bf16.msra.mxu0 %v919_v56 }
 0x244   :  { %864 = vmatprep.subr.bf16.mxu0 %v1046_v0 }
 0x247   :  { %865 = vmatpush3.bf16.msra.mxu0 %v920_v57 }
 0x248   :  { %866 = vmatprep.subr.bf16.mxu0 %v1046_v0 }
 0x24b   :  { %867 = vmatpush3.bf16.msra.mxu0 %v921_v4 }
 0x24c   :  { %868 = vmatprep.subr.bf16.mxu0 %v1046_v0 }
 0x24f   :  { %869 = vmatpush3.bf16.msra.mxu0 %v922_v5 }
 0x305   :  { %v441_v59 = vpop.f32.mrb[4].mxu0 }
 0x306   :  { %v442_v60 = vadd.f32 %v702_v58, %v441_v59  ;;  %v832_v61 = vpop.f32.mrb[5].mxu0 }
 0x307   :  { %v444_v62 = vpop.f32.mrb[6].mxu0 }
 0x308   :  { %v447_v63 = vmul.f32 0.1, %v442_v60  ;;  %v833_v1 = vpop.f32.mrb[7].mxu0 }
 0x30a   :  { %v448_v2 = vmax.f32 %v442_v60, %v447_v63 }
 0x30c   :  { %v449_v3 = vpack.c.bf16 %v448_v2, %v448_v2 }
 0x30e   :  { %851 = vmatmul.mubr.bf16.vlgmr.msra.gmra.mrb[4].mxu1 %v449_v3 }
 0x3e1   :  { %v555_v7 = vpop.f32.mrb[4].mxu1 }
 0x3e2   :  { %v556_v8 = vadd.f32 %v711_v6, %v555_v7  ;;  %v852_v9 = vpop.f32.mrb[5].mxu1 }
 0x3e3   :  { %v558_v10 = vpop.f32.mrb[6].mxu1 }
 0x3e4   :  { %v561_v11 = vmul.f32 0.1, %v556_v8  ;;  %v853_v12 = vpop.f32.mrb[7].mxu1 }
 0x3e6   :  { %v562_v13 = vmax.f32 %v556_v8, %v561_v11 }
 0x3e8   :  { %v563_v14 = vpack.c.bf16 %v562_v13, %v562_v13 }
 0x3ea   :  { %871 = vmatmul.mubr.bf16.vlgmr.msra.gmra.mrb[8].mxu0 %v563_v14 }
 0x4bd   :  { %v669_v0 = vpop.f32.mrb[8].mxu0 }
 0x4be   :  { %v670_v16 = vadd.f32 %v720_v15, %v669_v0  ;;  %v872_v17 = vpop.f32.mrb[9].mxu0 }
 0x4bf   :  { %v672_v18 = vpop.f32.mrb[10].mxu0 }
 0x4c0   :  { %v675_v19 = vpack.c.bf16 %v670_v16, %v670_v16  ;;  %v873_v20 = vpop.f32.mrb[11].mxu0 }
 0x4c2   :  { %676 = vst [vmem:[%s1279_s11] sm:$0xf] %v675_v19 }
 0x4c3   :  { %681 = vsyncpa [#allocation3], 1 }
 0x4c4   :  { %682 = vsyncpa [#allocation5], 1 }
 0x4c5   :  { %683 = vsyncpa [#allocation8], 1 }

</bundles_post_ra>
